<compile_context>
chip_gen: v5e
topology: v5e:2x2
jax: 0.10.0
libtpu: 0.0.40
codegen_flags: <defaults>
</compile_context>

<pallas_src>
from math import sqrt

import jax
import jax.numpy as jnp
from jax.experimental import pallas as pl
from jax.experimental.pallas import tpu as pltpu


# --------------------------------------------------------------------------
# Kernel
# --------------------------------------------------------------------------
def adapted_odenet_kernel(t_ref, x_ref, cproj_ref, wsq_ref, vecs_ref, out_ref):
    """One batch tile of the full L-layer ConcatSquash stack (lane-dense).

    t_ref     : SMEM (1, 1)   f32 -- scalar time
    x_ref     : VMEM (TB, DP)     -- lane-packed state tile      (DP = 4*dims)
    cproj_ref : VMEM (TB, DP)     -- lane-packed cond projection (cond @ W0[D:D+C])
    wsq_ref   : VMEM (L, DP, DP)  -- block-diagonal square weights (y = x @ W)
    vecs_ref  : VMEM (5G, DP)     -- [b ; wg ; bg ; wb ; w0_t-row], each group
                                     padded to G (=8) sublanes, lane-tiled 4x
    """
    L = wsq_ref.shape[0]
    G = vecs_ref.shape[0] // 5

    t = t_ref[0, 0]
    x = x_ref[...]
    cproj = cproj_ref[...]

    b_all = vecs_ref[0 * G:1 * G, :]          # [G, DP]
    wg_all = vecs_ref[1 * G:2 * G, :]
    bg_all = vecs_ref[2 * G:3 * G, :]
    wb_all = vecs_ref[3 * G:4 * G, :]
    tw_all = vecs_ref[4 * G:5 * G, :]         # W0 t-row at group-row 0, zeros elsewhere

    # Hoisted per-layer terms (one batched EUP/VPU pass over a single vreg tile):
    #   gates[l] = sigmoid(t*wg[l] + bg[l])
    #   beta[l]  = (b[l] + t*w0_t[l]) * gates[l] + t*wb[l]
    gates = jax.nn.sigmoid(t * wg_all + bg_all)           # [G, DP]
    beta = (b_all + t * tw_all) * gates + t * wb_all      # [G, DP]

    # ---- layer 0: concat fused via hoisted cond projection -----------------
    h = jnp.dot(x, wsq_ref[0], preferred_element_type=jnp.float32) + cproj
    dx = jnp.tanh(h * gates[0:1, :] + beta[0:1, :])

    # ---- middle layers: tanh residual (unrolled at trace time) -------------
    for l in range(1, L - 1):
        h = jnp.dot(dx, wsq_ref[l], preferred_element_type=jnp.float32)
        dx = jnp.tanh(h * gates[l:l + 1, :] + beta[l:l + 1, :]) + dx

    # ---- last layer: no activation, no residual ----------------------------
    h = jnp.dot(dx, wsq_ref[L - 1], preferred_element_type=jnp.float32)
    dx = h * gates[L - 1:L, :] + beta[L - 1:L, :]

    out_ref[...] = dx.astype(out_ref.dtype)


# --------------------------------------------------------------------------
# Parameter handling
# --------------------------------------------------------------------------
def init_params(key, dims, conditional_dims, num_layers=4):
    """Deterministic init mirroring the PyTorch module's parameter shapes."""
    d_in0 = dims + conditional_dims + 1
    params = []
    for l in range(num_layers):
        d_in = d_in0 if l == 0 else dims
        key, k1, k2, k3, k4, k5 = jax.random.split(key, 6)
        bound = 1.0 / sqrt(d_in)
        W = jax.random.uniform(k1, (d_in, dims), jnp.float32, -bound, bound)  # _layer.weight^T
        b = jax.random.uniform(k2, (1, dims), jnp.float32, -bound, bound)     # _layer.bias
        wg = jax.random.uniform(k3, (1, dims), jnp.float32, -1.0, 1.0)        # _hyper_gate.weight^T
        bg = jax.random.uniform(k4, (1, dims), jnp.float32, -1.0, 1.0)        # _hyper_gate.bias
        wb = jax.random.uniform(k5, (1, dims), jnp.float32, -1.0, 1.0)        # _hyper_bias.weight^T
        params.append((W, b, wg, bg, wb))
    return params


def _round_up(n, m):
    return ((n + m - 1) // m) * m


def pack_params(params, dims, cond_dims, lane_pack=4):
    """Pack per-layer params into lane-dense arrays.  Call once, reuse per call.

    Returns (w_sq [L, 4D, 4D] block-diagonal,
             w_cond [C, D] for the wrapper-side conditional projection,
             vecs [5G, 4D] with G = 8-sublane-aligned per-layer vector groups).
    """
    L = len(params)
    D = dims
    DP = lane_pack * D
    G = max(8, _round_up(L, 8))

    W0 = params[0][0]                                          # [D+C+1, D]
    eye = jnp.eye(lane_pack, dtype=jnp.float32)

    sq_list = [W0[:D]] + [params[l][0] for l in range(1, L)]   # each [D, D]
    w_sq = jnp.stack([jnp.kron(eye, W) for W in sq_list], 0)   # [L, DP, DP]

    w_cond = W0[D:D + cond_dims]                               # [C, D]
    w0_t = W0[D + cond_dims:D + cond_dims + 1]                 # [1, D]

    def group(rows):                                           # [n, D] -> [G, DP]
        g = jnp.tile(rows, (1, lane_pack))
        return jnp.pad(g, ((0, G - rows.shape[0]), (0, 0)))

    b_g = group(jnp.concatenate([p[1] for p in params], 0))
    wg_g = group(jnp.concatenate([p[2] for p in params], 0))
    bg_g = group(jnp.concatenate([p[3] for p in params], 0))
    wb_g = group(jnp.concatenate([p[4] for p in params], 0))
    tw_g = group(w0_t)                                         # row 0 = t-row of W0

    vecs = jnp.concatenate([b_g, wg_g, bg_g, wb_g, tw_g], 0)   # [5G, DP]
    return w_sq, w_cond, vecs


def precompute_cond_proj(conditioned, packed):
    """cond @ W0[D:D+C] -- constant across solver evaluations, compute once."""
    _, w_cond, _ = packed
    return conditioned.astype(jnp.float32) @ w_cond            # [B, D]


# --------------------------------------------------------------------------
# Forward wrapper
# --------------------------------------------------------------------------
def adapted_odenet_forward(t, x, cond_proj, packed, *, block_batch=2048):
    """x: [B, dims], cond_proj: [B, dims] (from precompute_cond_proj), t: scalar."""
    w_sq, _, vecs = packed
    B, dims = x.shape
    L, DP, _ = w_sq.shape
    lane_pack = DP // dims

    # ---- batch tiling in the packed-row domain ------------------------------
    R = pl.cdiv(B, lane_pack)                       # packed rows needed
    tb_max = max(8, block_batch // lane_pack)       # packed rows per tile (cap)
    if R <= 8:
        tb, R_pad = R, R                            # single full-extent tile
    else:
        R8 = _round_up(R, 8)
        # Aim for >= 2 blocks so v7x megacore ("parallel") shards the grid.
        tb = min(tb_max, max(8, _round_up(pl.cdiv(R8, 2), 8)))
        R_pad = _round_up(R8, tb)
    B_pad = R_pad * lane_pack
    n_blocks = R_pad // tb

    xp = x.astype(jnp.float32)
    cp = cond_proj.astype(jnp.float32)
    if B_pad != B:
        xp = jnp.pad(xp, ((0, B_pad - B), (0, 0)))
        cp = jnp.pad(cp, ((0, B_pad - B), (0, 0)))
    xp = xp.reshape(R_pad, DP)                      # lane-dense repack (row-major view)
    cp = cp.reshape(R_pad, DP)

    t_arr = jnp.full((1, 1), t, dtype=jnp.float32)

    # Explicit VMEM budget: 2 bufs x (x + cond_proj + out) tiles + resident params.
    tile_bytes = tb * DP * 4
    vmem_need = 2 * 3 * tile_bytes + 4 * (int(w_sq.size) + int(vecs.size)) + (2 << 20)
    vmem_limit = int(min(max(vmem_need, 4 << 20), 96 << 20))

    flops = 2 * R_pad * DP * DP * L
    transcendentals = (L - 1) * R_pad * DP + n_blocks * 2 * vecs.shape[0] * DP
    bytes_accessed = 4 * (xp.size + cp.size + int(w_sq.size) + int(vecs.size)
                          + 1 + R_pad * DP)

    out = pl.pallas_call(
        adapted_odenet_kernel,
        out_shape=jax.ShapeDtypeStruct((R_pad, DP), jnp.float32),
        grid=(n_blocks,),
        in_specs=[
            pl.BlockSpec((1, 1), lambda i: (0, 0),
                         memory_space=pltpu.MemorySpace.SMEM),     # t scalar
            pl.BlockSpec((tb, DP), lambda i: (i, 0)),              # x tile
            pl.BlockSpec((tb, DP), lambda i: (i, 0)),              # cond_proj tile
            pl.BlockSpec((L, DP, DP), lambda i: (0, 0, 0)),        # weights (resident)
            pl.BlockSpec((vecs.shape[0], DP), lambda i: (0, 0)),   # packed vectors
        ],
        out_specs=pl.BlockSpec((tb, DP), lambda i: (i, 0)),
        compiler_params=pltpu.CompilerParams(
            dimension_semantics=("parallel",),                     # v7x megacore
            vmem_limit_bytes=vmem_limit),
        cost_estimate=pl.CostEstimate(
            flops=flops, transcendentals=transcendentals,
            bytes_accessed=bytes_accessed),
    )(t_arr, xp, cp, w_sq, vecs)

    out = out.reshape(B_pad, dims)
    out = out[:B] if B_pad != B else out
    return out.astype(x.dtype)


# --------------------------------------------------------------------------
# Pure-JAX reference
# --------------------------------------------------------------------------
def ref_forward(t, x, conditioned, params):
    """Pure-JAX reference of AdaptedODENet.forward for verification."""
    B = x.shape[0]
    dx = jnp.concatenate([x, conditioned, jnp.full((B, 1), t, x.dtype)], axis=1)
    n = len(params)

    def csl(z, p):
        W, b, wg, bg, wb = p
        return (z @ W + b) * jax.nn.sigmoid(t * wg + bg) + t * wb

    for l, p in enumerate(params):
        if l < n - 1:
            a = csl(dx, p)
            dx = jnp.tanh(a) if l == 0 else jnp.tanh(a) + dx
        else:
            dx = csl(dx, p)
    return dx


# --------------------------------------------------------------------------
if __name__ == "__main__":
    key = jax.random.PRNGKey(0)
    dims, cond_dims, num_layers = 32, 7, 4
    t = 0.37

    kx1, kc1, kp, kx2, kc2 = jax.random.split(key, 5)
    params = init_params(kp, dims, cond_dims, num_layers=num_layers)
    packed = pack_params(params, dims, cond_dims)       # pack once, reuse per call

    # Case 1: tiny batch -> single full-extent lane-packed tile.
    B1 = 8
    x1 = jax.random.normal(kx1, (B1, dims), jnp.float32)
    c1 = jax.random.normal(kc1, (B1, cond_dims), jnp.float32)   # self.conditioned
    cp1 = precompute_cond_proj(c1, packed)                      # once per trajectory
    out1 = jax.block_until_ready(adapted_odenet_forward(t, x1, cp1, packed))
    ref1 = ref_forward(jnp.float32(t), x1, c1, params)
    assert out1.shape == (B1, dims)
    if not jnp.allclose(out1, ref1, atol=1e-4, rtol=1e-4):
        raise AssertionError("Pallas kernel mismatch vs reference (single tile)")

    # Case 2: multi-block batch grid with padding (weights stay resident,
    # >=2 grid blocks so v7x megacore would shard).
    B2 = 100
    x2 = jax.random.normal(kx2, (B2, dims), jnp.float32)
    c2 = jax.random.normal(kc2, (B2, cond_dims), jnp.float32)
    cp2 = precompute_cond_proj(c2, packed)
    out2 = jax.block_until_ready(
        adapted_odenet_forward(t, x2, cp2, packed, block_batch=64))
    ref2 = ref_forward(jnp.float32(t), x2, c2, params)
    assert out2.shape == (B2, dims)
    if not jnp.allclose(out2, ref2, atol=1e-4, rtol=1e-4):
        raise AssertionError("Pallas kernel mismatch vs reference (multi-block)")

    print("KERNEL_OK")
</pallas_src>

<mosaic_0001>
module attributes {stable_mosaic.version = 11 : i64} {
  func.func @adapted_odenet_kernel(%arg0: i32, %arg1: memref<1x1xf32, #tpu.memory_space<smem>>, %arg2: memref<2x128xf32, #tpu.memory_space<vmem>>, %arg3: memref<2x128xf32, #tpu.memory_space<vmem>>, %arg4: memref<4x128x128xf32, #tpu.memory_space<vmem>>, %arg5: memref<40x128xf32, #tpu.memory_space<vmem>>, %arg6: memref<2x128xf32, #tpu.memory_space<vmem>>) attributes {dimension_semantics = [#tpu.dimension_semantics<parallel>], iteration_bounds = array<i64: 1>, scalar_prefetch = 0 : i64, scratch_operands = 0 : i64, tpu.core_type = #tpu.core_type<tc>, window_params = [{transform_indices = @transform_0, window_bounds = array<i64: 1, 1>}, {transform_indices = @transform_1, window_bounds = array<i64: 2, 128>}, {transform_indices = @transform_2, window_bounds = array<i64: 2, 128>}, {pipeline_mode = #tpu.pipeline_mode<synchronous>, transform_indices = @transform_3, window_bounds = array<i64: 4, 128, 128>}, {pipeline_mode = #tpu.pipeline_mode<synchronous>, transform_indices = @transform_4, window_bounds = array<i64: 40, 128>}, {transform_indices = @transform_5, window_bounds = array<i64: 2, 128>}]} {
    %c0 = arith.constant 0 : index
    %c0_0 = arith.constant 0 : index
    %0 = memref.load %arg1[%c0, %c0_0] : memref<1x1xf32, #tpu.memory_space<smem>>
    %c0_1 = arith.constant 0 : index
    %c0_2 = arith.constant 0 : index
    %1 = vector.load %arg2[%c0_1, %c0_2] : memref<2x128xf32, #tpu.memory_space<vmem>>, vector<2x128xf32>
    %c0_3 = arith.constant 0 : index
    %c0_4 = arith.constant 0 : index
    %2 = vector.load %arg3[%c0_3, %c0_4] : memref<2x128xf32, #tpu.memory_space<vmem>>, vector<2x128xf32>
    %c0_5 = arith.constant 0 : index
    %c0_6 = arith.constant 0 : index
    %3 = vector.load %arg5[%c0_5, %c0_6] : memref<40x128xf32, #tpu.memory_space<vmem>>, vector<8x128xf32>
    %c8 = arith.constant 8 : index
    %c0_7 = arith.constant 0 : index
    %4 = vector.load %arg5[%c8, %c0_7] : memref<40x128xf32, #tpu.memory_space<vmem>>, vector<8x128xf32>
    %c16 = arith.constant 16 : index
    %c0_8 = arith.constant 0 : index
    %5 = vector.load %arg5[%c16, %c0_8] : memref<40x128xf32, #tpu.memory_space<vmem>>, vector<8x128xf32>
    %c24 = arith.constant 24 : index
    %c0_9 = arith.constant 0 : index
    %6 = vector.load %arg5[%c24, %c0_9] : memref<40x128xf32, #tpu.memory_space<vmem>>, vector<8x128xf32>
    %c32 = arith.constant 32 : index
    %c0_10 = arith.constant 0 : index
    %7 = vector.load %arg5[%c32, %c0_10] : memref<40x128xf32, #tpu.memory_space<vmem>>, vector<8x128xf32>
    %8 = vector.broadcast %0 : f32 to vector<8x128xf32>
    %9 = arith.mulf %8, %4 : vector<8x128xf32>
    %10 = arith.addf %9, %5 : vector<8x128xf32>
    %11 = arith.negf %10 : vector<8x128xf32>
    %12 = math.exp %11 : vector<8x128xf32>
    %cst = arith.constant 1.000000e+00 : f32
    %13 = vector.broadcast %cst : f32 to vector<8x128xf32>
    %14 = arith.addf %13, %12 : vector<8x128xf32>
    %15 = arith.divf %13, %14 : vector<8x128xf32>
    %16 = vector.broadcast %0 : f32 to vector<8x128xf32>
    %17 = arith.mulf %16, %7 : vector<8x128xf32>
    %18 = arith.addf %3, %17 : vector<8x128xf32>
    %19 = arith.mulf %18, %15 : vector<8x128xf32>
    %20 = vector.broadcast %0 : f32 to vector<8x128xf32>
    %21 = arith.mulf %20, %6 : vector<8x128xf32>
    %22 = arith.addf %19, %21 : vector<8x128xf32>
    %c0_11 = arith.constant 0 : index
    %c0_12 = arith.constant 0 : index
    %c0_13 = arith.constant 0 : index
    %23 = vector.load %arg4[%c0_11, %c0_12, %c0_13] : memref<4x128x128xf32, #tpu.memory_space<vmem>>, vector<1x128x128xf32>
    %24 = vector.shape_cast %23 : vector<1x128x128xf32> to vector<128x128xf32>
    %cst_14 = arith.constant dense<0.000000e+00> : vector<2x128xf32>
    %25 = tpu.matmul %1, %24, %cst_14 {dimension_numbers = #tpu.dot_dimension_numbers<[1], [0], [0], [1], [0, 0, 1, 1], [], []>} : vector<2x128xf32>, vector<128x128xf32>, vector<2x128xf32> -> vector<2x128xf32>
    %26 = arith.addf %25, %2 : vector<2x128xf32>
    %27 = vector.extract_strided_slice %15 {offsets = [0, 0], sizes = [1, 128], strides = [1, 1]} : vector<8x128xf32> to vector<1x128xf32>
    %28 = vector.broadcast %27 : vector<1x128xf32> to vector<2x128xf32>
    %29 = arith.mulf %26, %28 : vector<2x128xf32>
    %30 = vector.extract_strided_slice %22 {offsets = [0, 0], sizes = [1, 128], strides = [1, 1]} : vector<8x128xf32> to vector<1x128xf32>
    %31 = vector.broadcast %30 : vector<1x128xf32> to vector<2x128xf32>
    %32 = arith.addf %29, %31 : vector<2x128xf32>
    %33 = math.tanh %32 : vector<2x128xf32>
    %c1 = arith.constant 1 : index
    %c0_15 = arith.constant 0 : index
    %c0_16 = arith.constant 0 : index
    %34 = vector.load %arg4[%c1, %c0_15, %c0_16] : memref<4x128x128xf32, #tpu.memory_space<vmem>>, vector<1x128x128xf32>
    %35 = vector.shape_cast %34 : vector<1x128x128xf32> to vector<128x128xf32>
    %cst_17 = arith.constant dense<0.000000e+00> : vector<2x128xf32>
    %36 = tpu.matmul %33, %35, %cst_17 {dimension_numbers = #tpu.dot_dimension_numbers<[1], [0], [0], [1], [0, 0, 1, 1], [], []>} : vector<2x128xf32>, vector<128x128xf32>, vector<2x128xf32> -> vector<2x128xf32>
    %37 = vector.extract_strided_slice %15 {offsets = [1, 0], sizes = [1, 128], strides = [1, 1]} : vector<8x128xf32> to vector<1x128xf32>
    %38 = vector.broadcast %37 : vector<1x128xf32> to vector<2x128xf32>
    %39 = arith.mulf %36, %38 : vector<2x128xf32>
    %40 = vector.extract_strided_slice %22 {offsets = [1, 0], sizes = [1, 128], strides = [1, 1]} : vector<8x128xf32> to vector<1x128xf32>
    %41 = vector.broadcast %40 : vector<1x128xf32> to vector<2x128xf32>
    %42 = arith.addf %39, %41 : vector<2x128xf32>
    %43 = math.tanh %42 : vector<2x128xf32>
    %44 = arith.addf %43, %33 : vector<2x128xf32>
    %c2 = arith.constant 2 : index
    %c0_18 = arith.constant 0 : index
    %c0_19 = arith.constant 0 : index
    %45 = vector.load %arg4[%c2, %c0_18, %c0_19] : memref<4x128x128xf32, #tpu.memory_space<vmem>>, vector<1x128x128xf32>
    %46 = vector.shape_cast %45 : vector<1x128x128xf32> to vector<128x128xf32>
    %cst_20 = arith.constant dense<0.000000e+00> : vector<2x128xf32>
    %47 = tpu.matmul %44, %46, %cst_20 {dimension_numbers = #tpu.dot_dimension_numbers<[1], [0], [0], [1], [0, 0, 1, 1], [], []>} : vector<2x128xf32>, vector<128x128xf32>, vector<2x128xf32> -> vector<2x128xf32>
    %48 = vector.extract_strided_slice %15 {offsets = [2, 0], sizes = [1, 128], strides = [1, 1]} : vector<8x128xf32> to vector<1x128xf32>
    %49 = vector.broadcast %48 : vector<1x128xf32> to vector<2x128xf32>
    %50 = arith.mulf %47, %49 : vector<2x128xf32>
    %51 = vector.extract_strided_slice %22 {offsets = [2, 0], sizes = [1, 128], strides = [1, 1]} : vector<8x128xf32> to vector<1x128xf32>
    %52 = vector.broadcast %51 : vector<1x128xf32> to vector<2x128xf32>
    %53 = arith.addf %50, %52 : vector<2x128xf32>
    %54 = math.tanh %53 : vector<2x128xf32>
    %55 = arith.addf %54, %44 : vector<2x128xf32>
    %c3 = arith.constant 3 : index
    %c0_21 = arith.constant 0 : index
    %c0_22 = arith.constant 0 : index
    %56 = vector.load %arg4[%c3, %c0_21, %c0_22] : memref<4x128x128xf32, #tpu.memory_space<vmem>>, vector<1x128x128xf32>
    %57 = vector.shape_cast %56 : vector<1x128x128xf32> to vector<128x128xf32>
    %cst_23 = arith.constant dense<0.000000e+00> : vector<2x128xf32>
    %58 = tpu.matmul %55, %57, %cst_23 {dimension_numbers = #tpu.dot_dimension_numbers<[1], [0], [0], [1], [0, 0, 1, 1], [], []>} : vector<2x128xf32>, vector<128x128xf32>, vector<2x128xf32> -> vector<2x128xf32>
    %59 = vector.extract_strided_slice %15 {offsets = [3, 0], sizes = [1, 128], strides = [1, 1]} : vector<8x128xf32> to vector<1x128xf32>
    %60 = vector.broadcast %59 : vector<1x128xf32> to vector<2x128xf32>
    %61 = arith.mulf %58, %60 : vector<2x128xf32>
    %62 = vector.extract_strided_slice %22 {offsets = [3, 0], sizes = [1, 128], strides = [1, 1]} : vector<8x128xf32> to vector<1x128xf32>
    %63 = vector.broadcast %62 : vector<1x128xf32> to vector<2x128xf32>
    %64 = arith.addf %61, %63 : vector<2x128xf32>
    %c0_24 = arith.constant 0 : index
    %c0_25 = arith.constant 0 : index
    %65 = vector.load %arg6[%c0_24, %c0_25] : memref<2x128xf32, #tpu.memory_space<vmem>>, vector<2x128xf32>
    tpu.vector_store %arg6[%c0_24, %c0_25], %64 {strides = array<i32>} : memref<2x128xf32, #tpu.memory_space<vmem>>, vector<2x128xf32>,
    return
  }
  func.func @transform_0(%arg0: i32) -> (i32, i32) {
    %c0_i32 = arith.constant 0 : i32
    %c0_i32_0 = arith.constant 0 : i32
    %c0_i32_1 = arith.constant 0 : i32
    return %c0_i32, %c0_i32_0 : i32, i32
  }
  func.func @transform_1(%arg0: i32) -> (i32, i32) {
    %c0_i32 = arith.constant 0 : i32
    %c0_i32_0 = arith.constant 0 : i32
    return %arg0, %c0_i32 : i32, i32
  }
  func.func @transform_2(%arg0: i32) -> (i32, i32) {
    %c0_i32 = arith.constant 0 : i32
    %c0_i32_0 = arith.constant 0 : i32
    return %arg0, %c0_i32 : i32, i32
  }
  func.func @transform_3(%arg0: i32) -> (i32, i32, i32) {
    %c0_i32 = arith.constant 0 : i32
    %c0_i32_0 = arith.constant 0 : i32
    %c0_i32_1 = arith.constant 0 : i32
    %c0_i32_2 = arith.constant 0 : i32
    return %c0_i32, %c0_i32_0, %c0_i32_1 : i32, i32, i32
  }
  func.func @transform_4(%arg0: i32) -> (i32, i32) {
    %c0_i32 = arith.constant 0 : i32
    %c0_i32_0 = arith.constant 0 : i32
    %c0_i32_1 = arith.constant 0 : i32
    return %c0_i32, %c0_i32_0 : i32, i32
  }
  func.func @transform_5(%arg0: i32) -> (i32, i32) {
    %c0_i32 = arith.constant 0 : i32
    %c0_i32_0 = arith.constant 0 : i32
    return %arg0, %c0_i32 : i32, i32
  }
}

</mosaic_0001>

<bundles_post_ra>
// kernel: tpu_custom_call.1
= control target key start
LH: loop header
LB: loop body
LE: loop exit
PB: predicated region body
PF: predicated region fallthrough
CT: control target
= control target key end

     0   :  { %11 = vsyncpa [#allocation4], 0  ;;  %s475_s0 = inlined_call_operand.<no memory space> [shape: f32[1,1], index: 0, kind: input, shape index: {}]   ;;  %s476_s1 = inlined_call_operand.vmem [shape: f32[2,128], index: 1, kind: input, shape index: {}]   ;;  %s477_s2 = inlined_call_operand.hbm [shape: f32[2,128], index: 2, kind: input, shape index: {}]   ;;  %s478_s3 = inlined_call_operand.hbm [shape: f32[4,128,128], index: 3, kind: input, shape index: {}]   ;;  %s479_s4 = inlined_call_operand.hbm [shape: f32[40,128], index: 4, kind: input, shape index: {}]   ;;  %s480_s5 = inlined_call_operand.hbm [shape: f32[2,128], index: 5, kind: output, shape index: {}]  }
   0x1   :  { %12 = vsyncpa [#allocation7], 0  ;;  %s33_s20 = sshll.u32 %s478_s3, 4  ;;  %s34_s20 = int_to_ptr.hbm [resolvable:$true] %s33_s20 }
   0x2   :  { %13 = vsyncpa [#allocation5], 0  ;;  %s408_s21 = smov [#allocation6]   ;;  %s23_s25 = sshll.u32 %s477_s2, 4  ;;  %s24_s25 = int_to_ptr.hbm [resolvable:$true] %s23_s25 }
   0x3   :  { %s35_s22 = sshll.u32 %s408_s21, 4  ;;  %s409_s26 = smov 128   ;;  %s36_s22 = int_to_ptr.vmem [resolvable:$true] %s35_s22 }
   0x4   :  { %s410_s27 = smov 8   ;;  %s411_s28 = smov [#allocation3]  }
   0x5   :  { %41 = dma.hbm_to_vmem [thread:$0]  %s34_s20, 8192, %s36_s22, [#allocation7], %s409_s26, %s409_s26, %s410_s27  }
   0x6   :  { %s25_s29 = sshll.u32 %s411_s28, 4  ;;  %s46_s7 = sshll.u32 %s479_s4, 4  ;;  %s26_s29 = int_to_ptr.vmem [resolvable:$true] %s25_s29  ;;  %s47_s7 = int_to_ptr.hbm [resolvable:$true] %s46_s7 }
   0x7   :  { %28 = dma.hbm_to_vmem [thread:$0]  %s24_s25, 32, %s26_s29, [#allocation4]  }
   0x8   :  { %s412_s3 = smov [#allocation8]  }
   0x9   :  { %s48_s8 = sshll.u32 %s412_s3, 4  ;;  %s49_s8 = int_to_ptr.vmem [resolvable:$true] %s48_s8 }
   0xa   :  { %54 = dma.hbm_to_vmem [thread:$0]  %s47_s7, 640, %s49_s8, [#allocation7], %s409_s26, %s409_s26, %s410_s27  }
   0xb   :  { %402 = dma.done.wait [#allocation4], 32  }
   0xc   :  { %403 = vsyncadd [#allocation4], 4294967264 }
   0xd   :  { %404 = dma.done.wait [#allocation7], 8832  }
   0xe   :  { %405 = vsyncadd [#allocation7], 4294958464  ;;  %v117_v0 = vld [vmem:[#allocation6 + $0x78] sm:$0xff]  ;;  %v116_v1 = vld [vmem:[#allocation6 + $0x70] sm:$0xff]  ;;  %v75_v27 = vstv %s475_s0  ;;  %s413_s0 = smov [#allocation9]   ;;  %s278_s13 = sshll.u32 %s480_s5, 4  ;;  %s279_s13 = int_to_ptr.hbm [resolvable:$true] %s278_s13 }
   0xf   :  { %118 = vmatpush.msra.mxu0 %v117_v0  ;;  %v115_v2 = vld [vmem:[#allocation6 + $0x68] sm:$0xff]  ;;  %v114_v3 = vld [vmem:[#allocation6 + $0x60] sm:$0xff]  ;;  %v159_v4 = vld [vmem:[#allocation6 + $0xf8] sm:$0xff] }
  0x10   :  { %v113_v5 = vld [vmem:[#allocation6 + $0x58] sm:$0xff]  ;;  %160 = vmatpush.msra.mxu1 %v159_v4  ;;  %v158_v6 = vld [vmem:[#allocation6 + $0xf0] sm:$0xff]  ;;  %v157_v7 = vld [vmem:[#allocation6 + $0xe8] sm:$0xff] }
  0x11   :  { %119 = vmatpush.msra.mxu0 %v116_v1  ;;  %v112_v8 = vld [vmem:[#allocation6 + $0x50] sm:$0xff]  ;;  %v156_v9 = vld [vmem:[#allocation6 + $0xe0] sm:$0xff]  ;;  %v111_v10 = vld [vmem:[#allocation6 + $0x48] sm:$0xff] }
  0x12   :  { %161 = vmatpush.msra.mxu1 %v158_v6  ;;  %v155_v11 = vld [vmem:[#allocation6 + $0xd8] sm:$0xff]  ;;  %v110_v12 = vld [vmem:[#allocation6 + $0x40] sm:$0xff]  ;;  %v154_v13 = vld [vmem:[#allocation6 + $0xd0] sm:$0xff] }
  0x13   :  { %120 = vmatpush.msra.mxu0 %v115_v2  ;;  %v109_v14 = vld [vmem:[#allocation6 + $0x38] sm:$0xff]  ;;  %v153_v15 = vld [vmem:[#allocation6 + $0xc8] sm:$0xff]  ;;  %v108_v16 = vld [vmem:[#allocation6 + $0x30] sm:$0xff] }
  0x14   :  { %162 = vmatpush.msra.mxu1 %v157_v7  ;;  %v152_v17 = vld [vmem:[#allocation6 + $0xc0] sm:$0xff]  ;;  %v107_v18 = vld [vmem:[#allocation6 + $0x28] sm:$0xff]  ;;  %v151_v19 = vld [vmem:[#allocation6 + $0xb8] sm:$0xff] }
  0x15   :  { %121 = vmatpush.msra.mxu0 %v114_v3  ;;  %v106_v20 = vld [vmem:[#allocation6 + $0x20] sm:$0xff]  ;;  %v105_v21 = vld [vmem:[#allocation6 + $0x18] sm:$0xff]  ;;  %v104_v22 = vld [vmem:[#allocation6 + $0x10] sm:$0xff] }
  0x16   :  { %163 = vmatpush.msra.mxu1 %v156_v9  ;;  %v103_v23 = vld [vmem:[#allocation6 + $0x8] sm:$0xff]  ;;  %v102_v24 = vld [vmem:[#allocation6] sm:$0xff]  ;;  %v68_v25 = vld [vmem:[%s476_s1] sm:$0x3]  ;;  %s276_s1 = sshll.u32 %s413_s0, 4  ;;  %s277_s1 = int_to_ptr.vmem [resolvable:$true] %s276_s1 }
  0x17   :  { %122 = vmatpush.msra.mxu0 %v113_v5  ;;  %v71_v26 = vld [vmem:[#allocation8 + $0x8] sm:$0xff]  ;;  %v72_v29 = vld [vmem:[#allocation8 + $0x10] sm:$0xff]  ;;  %v148_v38 = vld [vmem:[#allocation6 + $0xa0] sm:$0xff] }
  0x18   :  { %164 = vmatpush.msra.mxu1 %v155_v11  ;;  %v76_v28 = vmul.f32 %v75_v27, %v71_v26  ;;  %v150_v35 = vld [vmem:[#allocation6 + $0xb0] sm:$0xff]  ;;  %v149_v36 = vld [vmem:[#allocation6 + $0xa8] sm:$0xff]  ;;  %v147_v39 = vld [vmem:[#allocation6 + $0x98] sm:$0xff] }
  0x19   :  { %123 = vmatpush.msra.mxu0 %v112_v8  ;;  %v146_v41 = vld [vmem:[#allocation6 + $0x90] sm:$0xff]  ;;  %v145_v42 = vld [vmem:[#allocation6 + $0x88] sm:$0xff]  ;;  %v144_v43 = vld [vmem:[#allocation6 + $0x80] sm:$0xff] }
  0x1a   :  { %165 = vmatpush.msra.mxu1 %v154_v13  ;;  %v77_v30 = vadd.f32 %v76_v28, %v72_v29  ;;  %v74_v45 = vld [vmem:[#allocation8 + $0x20] sm:$0xff]  ;;  %v202_v47 = vld [vmem:[#allocation6 + $0x178] sm:$0xff]  ;;  %v201_v48 = vld [vmem:[#allocation6 + $0x170] sm:$0xff] }
  0x1b   :  { %124 = vmatpush.msra.mxu0 %v111_v10  ;;  %203 = vmatpush.msra.mxu2 %v202_v47  ;;  %v200_v51 = vld [vmem:[#allocation6 + $0x168] sm:$0xff]  ;;  %v97_v52 = vmul.f32 %v75_v27, %v74_v45  ;;  %v70_v53 = vld [vmem:[#allocation8] sm:$0xff]  ;;  %v198_v57 = vld [vmem:[#allocation6 + $0x158] sm:$0xff] }
  0x1c   :  { %166 = vmatpush.msra.mxu1 %v153_v15  ;;  %v289_v31 = vmul.f32 -1.442695, %v77_v30  ;;  %v199_v55 = vld [vmem:[#allocation6 + $0x160] sm:$0xff]  ;;  %v73_v59 = vld [vmem:[#allocation8 + $0x18] sm:$0xff]  ;;  %v197_v61 = vld [vmem:[#allocation6 + $0x150] sm:$0xff] }
  0x1d   :  { %125 = vmatpush.msra.mxu0 %v110_v12  ;;  %204 = vmatpush.msra.mxu2 %v201_v48  ;;  %v98_v58 = vadd.f32 %v97_v52, %v70_v53  ;;  %v196_v62 = vld [vmem:[#allocation6 + $0x148] sm:$0xff]  ;;  %v100_v0 = vmul.f32 %v75_v27, %v73_v59  ;;  %v195_v1 = vld [vmem:[#allocation6 + $0x140] sm:$0xff]  ;;  %v194_v2 = vld [vmem:[#allocation6 + $0x138] sm:$0xff] }
  0x1e   :  { %167 = vmatpush.msra.mxu1 %v152_v17  ;;  %296 = vpow2.f32 %v289_v31  ;;  %v69_v4 = vld [vmem:[#allocation3] sm:$0x3]  ;;  %v193_v12 = vld [vmem:[#allocation6 + $0x130] sm:$0xff]  ;;  %v192_v13 = vld [vmem:[#allocation6 + $0x128] sm:$0xff] }
  0x1f   :  { %126 = vmatpush.msra.mxu0 %v109_v14  ;;  %205 = vmatpush.msra.mxu2 %v200_v51  ;;  %v191_v14 = vld [vmem:[#allocation6 + $0x120] sm:$0xff]  ;;  %v190_v15 = vld [vmem:[#allocation6 + $0x118] sm:$0xff]  ;;  %v188_v17 = vld [vmem:[#allocation6 + $0x108] sm:$0xff] }
  0x20   :  { %168 = vmatpush.msra.mxu1 %v151_v19  ;;  %v245_v19 = vld [vmem:[#allocation6 + $0x1f8] sm:$0xff]  ;;  %v238_v26 = vld [vmem:[#allocation6 + $0x1c0] sm:$0xff] }
  0x21   :  { %127 = vmatpush.msra.mxu0 %v108_v16  ;;  %206 = vmatpush.msra.mxu2 %v199_v55  ;;  %v189_v16 = vld [vmem:[#allocation6 + $0x110] sm:$0xff]  ;;  %v237_v27 = vld [vmem:[#allocation6 + $0x1b8] sm:$0xff] }
  0x22   :  { %169 = vmatpush.msra.mxu1 %v150_v35  ;;  %246 = vmatpush.msra.mxu3 %v245_v19  ;;  %v236_v35 = vld [vmem:[#allocation6 + $0x1b0] sm:$0xff] }
  0x23   :  { %128 = vmatpush.msra.mxu0 %v107_v18  ;;  %207 = vmatpush.msra.mxu2 %v198_v57  ;;  %v187_v18 = vld [vmem:[#allocation6 + $0x100] sm:$0xff] }
  0x24   :  { %v297_v32 = vpop.eup %296  ;;  %170 = vmatpush.msra.mxu1 %v149_v36  ;;  %v235_v36 = vld [vmem:[#allocation6 + $0x1a8] sm:$0xff] }
  0x25   :  { %129 = vmatpush.msra.mxu0 %v106_v20  ;;  %v81_v33 = vadd.f32 1.0, %v297_v32  ;;  %208 = vmatpush.msra.mxu2 %v197_v61  ;;  %v244_v20 = vld [vmem:[#allocation6 + $0x1f0] sm:$0xff] }
  0x26   :  { %171 = vmatpush.msra.mxu1 %v148_v38  ;;  %247 = vmatpush.msra.mxu3 %v244_v20  ;;  %v233_v38 = vld [vmem:[#allocation6 + $0x198] sm:$0xff] }
  0x27   :  { %130 = vmatpush.msra.mxu0 %v105_v21  ;;  %298 = vrcp.f32 %v81_v33  ;;  %vm87_vm0 = vweird.f32 %v81_v33  ;;  %v93_v46 = vand.u32 2147483648, %v81_v33  ;;  %v91_v50 = vand.u32 2147483647, %v81_v33  ;;  %209 = vmatpush.msra.mxu2 %v196_v62  ;;  %v243_v21 = vld [vmem:[#allocation6 + $0x1e8] sm:$0xff] }
  0x28   :  { %172 = vmatpush.msra.mxu1 %v147_v39  ;;  %248 = vmatpush.msra.mxu3 %v243_v21  ;;  %v232_v39 = vld [vmem:[#allocation6 + $0x190] sm:$0xff] }
  0x29   :  { %131 = vmatpush.msra.mxu0 %v104_v22  ;;  %v94_v54 = vor.u32 1.1754944e-38, %v93_v46  ;;  %vm92_vm3 = vcmp.eq.f32.partialorder %v91_v50, 8.507059e+37  ;;  %210 = vmatpush.msra.mxu2 %v195_v1  ;;  %v242_v22 = vld [vmem:[#allocation6 + $0x1e0] sm:$0xff] }
  0x2a   :  { %173 = vmatpush.msra.mxu1 %v146_v41  ;;  %249 = vmatpush.msra.mxu3 %v242_v22  ;;  %v230_v41 = vld [vmem:[#allocation6 + $0x180] sm:$0xff] }
  0x2b   :  { %132 = vmatpush.msra.mxu0 %v103_v23  ;;  %211 = vmatpush.msra.mxu2 %v194_v2  ;;  %v241_v23 = vld [vmem:[#allocation6 + $0x1d8] sm:$0xff] }
  0x2c   :  { %174 = vmatpush.msra.mxu1 %v145_v42  ;;  %250 = vmatpush.msra.mxu3 %v241_v23 }
  0x2d   :  { %133 = vmatpush.msra.mxu0 %v102_v24  ;;  %v299_v34 = vpop.eup %298  ;;  %212 = vmatpush.msra.mxu2 %v193_v12  ;;  %v240_v24 = vld [vmem:[#allocation6 + $0x1d0] sm:$0xff] }
  0x2e   :  { %134 = vmatmul.f32.vlgmr.msra.gmra.mxu0 %v68_v25  ;;  %v83_v37 = vmul.f32 %v299_v34, %v81_v33  ;;  %vm88_vm1 = vweird.f32 %v299_v34  ;;  %175 = vmatpush.msra.mxu1 %v144_v43  ;;  %v239_v25 = vld [vmem:[#allocation6 + $0x1c8] sm:$0xff] }
  0x2f   :  { %vm89_vm2 = vmor %vm87_vm0, %vm88_vm1  ;;  %213 = vmatpush.msra.mxu2 %v192_v13  ;;  %251 = vmatpush.msra.mxu3 %v240_v24 }
  0x30   :  { %v84_v40 = vsub.f32 1.0, %v83_v37  ;;  %v234_v37 = vld [vmem:[#allocation6 + $0x1a0] sm:$0xff] }
  0x31   :  { %214 = vmatpush.msra.mxu2 %v191_v14  ;;  %252 = vmatpush.msra.mxu3 %v239_v25 }
  0x32   :  { %v85_v44 = vmul.f32 %v299_v34, %v84_v40  ;;  %v231_v40 = vld [vmem:[#allocation6 + $0x188] sm:$0xff] }
  0x33   :  { %215 = vmatpush.msra.mxu2 %v190_v15  ;;  %253 = vmatpush.msra.mxu3 %v238_v26 }
  0x34   :  { %v86_v49 = vadd.f32 %v299_v34, %v85_v44 }
  0x35   :  { %216 = vmatpush.msra.mxu2 %v189_v16  ;;  %254 = vmatpush.msra.mxu3 %v237_v27 }
  0x36   :  { %v90_v56 = vsel %vm89_vm2, %v299_v34, %v86_v49 }
  0x37   :  { %v459_v60 = vsel %vm92_vm3, %v94_v54, %v90_v56  ;;  %217 = vmatpush.msra.mxu2 %v188_v17  ;;  %255 = vmatpush.msra.mxu3 %v236_v35 }
  0x38   :  { %v99_v63 = vmul.f32 %v98_v58, %v459_v60  ;;  %v138_v5 = vperm.slane %v459_v60, 0  ;;  %v180_v28 = vperm.slane %v459_v60, 1  ;;  %v223_v42 = vperm.slane %v459_v60, 2 }
  0x39   :  { %218 = vmatpush.msra.mxu2 %v187_v18  ;;  %256 = vmatpush.msra.mxu3 %v235_v36  ;;  %v266_v49 = vperm.slane %v459_v60, 3 }
  0x3a   :  { %v462_v3 = vadd.f32 %v100_v0, %v99_v63 }
  0x3b   :  { %257 = vmatpush.msra.mxu3 %v234_v37 }
  0x3c   :  { %v140_v8 = vperm.slane %v462_v3, 0  ;;  %v182_v29 = vperm.slane %v462_v3, 1  ;;  %v225_v43 = vperm.slane %v462_v3, 2  ;;  %v268_v50 = vperm.slane %v462_v3, 3 }
  0x3d   :  { %258 = vmatpush.msra.mxu3 %v233_v38 }
  0x3f   :  { %259 = vmatpush.msra.mxu3 %v232_v39 }
  0x41   :  { %260 = vmatpush.msra.mxu3 %v231_v40 }
  0x43   :  { %261 = vmatpush.msra.mxu3 %v230_v41 }
  0xab   :  { %v135_v6 = vpop.f32.mrf.mxu0 }
  0xac   :  { %v136_v7 = vadd.f32 %v135_v6, %v69_v4 }
  0xae   :  { %v139_v9 = vmul.f32 %v138_v5, %v136_v7 }
  0xb0   :  { %v141_v10 = vadd.f32 %v140_v8, %v139_v9 }
  0xb2   :  { %300 = vtanh.f32 %v141_v10 }
  0xb8   :  { %v301_v11 = vpop.eup %300 }
  0xb9   :  { %176 = vmatmul.f32.vlgmr.msra.gmra.mxu1 %v301_v11 }
 0x136   :  { %v177_v30 = vpop.f32.mrf.mxu1 }
 0x137   :  { %v181_v31 = vmul.f32 %v180_v28, %v177_v30 }
 0x139   :  { %v183_v32 = vadd.f32 %v182_v29, %v181_v31 }
 0x13b   :  { %302 = vtanh.f32 %v183_v32 }
 0x141   :  { %v303_v33 = vpop.eup %302 }
 0x142   :  { %v185_v34 = vadd.f32 %v303_v33, %v301_v11 }
 0x144   :  { %219 = vmatmul.f32.vlgmr.msra.gmra.mxu2 %v185_v34 }
 0x1c7   :  { %v220_v44 = vpop.f32.mrf.mxu2 }
 0x1c8   :  { %v224_v45 = vmul.f32 %v223_v42, %v220_v44 }
 0x1ca   :  { %v226_v46 = vadd.f32 %v225_v43, %v224_v45 }
 0x1cc   :  { %304 = vtanh.f32 %v226_v46 }
 0x1d2   :  { %v305_v47 = vpop.eup %304 }
 0x1d3   :  { %v228_v48 = vadd.f32 %v305_v47, %v185_v34 }
 0x1d5   :  { %262 = vmatmul.f32.vlgmr.msra.gmra.mxu3 %v228_v48 }
 0x258   :  { %v263_v51 = vpop.f32.mrf.mxu3 }
 0x259   :  { %v267_v52 = vmul.f32 %v266_v49, %v263_v51 }
 0x25b   :  { %v269_v53 = vadd.f32 %v268_v50, %v267_v52 }
 0x25d   :  { %270 = vst [vmem:[#allocation9] sm:$0x3] %v269_v53 }
 0x25e   :  { %281 = dma.vmem_to_hbm [thread:$0]  %s277_s1, 32, %s279_s13, [#allocation5]  }
 0x25f   :  { %406 = dma.done.wait [#allocation5], 32  }
 0x260   :  { %407 = vsyncadd [#allocation5], 4294967264 }
 0x261   :  { %286 = vsyncpa [#allocation4], 1 }
 0x262   :  { %287 = vsyncpa [#allocation7], 1 }
 0x263   :  { %288 = vsyncpa [#allocation5], 1 }

</bundles_post_ra>
